<compile_context>
chip_gen: v6e
topology: v6e:2x2x1
jax: 0.10.0
libtpu: 0.0.40
codegen_flags: <defaults>
</compile_context>

<pallas_src>
import jax
import jax.numpy as jnp
from jax.experimental import pallas as pl
from jax.experimental.pallas import tpu as pltpu


def _token_pos_embed_kernel(ids_ref, tok_tbl_ref, pos_tbl_ref, o_ref):
    """Fused token-embedding gather + positional-embedding broadcast add.

    ids_ref     : (B*S, 1) int32   token ids, flattened over (batch, seq)
    tok_tbl_ref : (NB, D)  float32 token embedding table
    pos_tbl_ref : (S, D)   float32 positional embedding table
    o_ref       : (B, S, D) float32 output (lane-dense last dim)
    """
    b, s, d = o_ref.shape
    nb = tok_tbl_ref.shape[0]
    bs = b * s

    ids = ids_ref[...]                                              # (B*S, 1)

    # --- token embedding: one-hot gather on the MXU (exact in f32 at HIGHEST) ---
    tok_cols = jax.lax.broadcasted_iota(jnp.int32, (bs, nb), 1)
    tok_onehot = (ids == tok_cols).astype(jnp.float32)              # (B*S, NB)
    tok = jnp.dot(tok_onehot, tok_tbl_ref[...],
                  preferred_element_type=jnp.float32,
                  precision=jax.lax.Precision.HIGHEST)              # (B*S, D)

    # --- positional embedding: plain VPU broadcast add, fused into the store.
    #     B is a small static Python int -> fully unrolled; each slice start
    #     (bi * S) is a multiple of S=64, so no (8,128) tile-boundary copies.
    pos = pos_tbl_ref[...]                                          # (S, D)
    for bi in range(b):
        o_ref[bi] = tok[bi * s:(bi + 1) * s, :] + pos


def token_and_position_embedding(ids, token_table, pos_table):
    """ids: (B, S) int32 -> (B, S, D) float32 (token emb + positional emb)."""
    b, s = ids.shape
    nb, d = token_table.shape
    assert pos_table.shape == (s, d)

    ids_flat = ids.reshape(b * s, 1).astype(jnp.int32)

    out = pl.pallas_call(
        _token_pos_embed_kernel,
        out_shape=jax.ShapeDtypeStruct((b, s, d), jnp.float32),
        grid=(1,),
        in_specs=[
            pl.BlockSpec((b * s, 1), lambda i: (0, 0)),    # ids (full block)
            pl.BlockSpec((nb, d), lambda i: (0, 0)),       # token table (untiled)
            pl.BlockSpec((s, d), lambda i: (0, 0)),        # pos table (untiled, no tile/repeat)
        ],
        out_specs=pl.BlockSpec((b, s, d), lambda i: (0, 0, 0)),
        compiler_params=pltpu.CompilerParams(
            dimension_semantics=("arbitrary",)),
    )(ids_flat, token_table, pos_table)

    return out


if __name__ == "__main__":
    BATCH, SEQ_LEN, N_BINS, LATENT_DIM = 2, 64, 32, 128

    key = jax.random.PRNGKey(0)
    k_tok, k_pos, k_ids = jax.random.split(key, 3)
    token_table = (0.02 * jax.random.normal(k_tok, (N_BINS, LATENT_DIM))).astype(jnp.float32)
    pos_table = (0.02 * jax.random.normal(k_pos, (SEQ_LEN, LATENT_DIM))).astype(jnp.float32)
    ids = jax.random.randint(k_ids, (BATCH, SEQ_LEN), 0, N_BINS, dtype=jnp.int32)

    out = token_and_position_embedding(ids, token_table, pos_table)
    jax.block_until_ready(out)

    # pure-JAX reference: embedding gather + broadcast positional add
    ref = token_table[ids] + pos_table[None, :, :]

    assert out.shape == (BATCH, SEQ_LEN, LATENT_DIM), out.shape
    assert bool(jnp.all(jnp.isfinite(out)))
    assert bool(jnp.allclose(out, ref, atol=5e-4, rtol=1e-4)), float(jnp.max(jnp.abs(out - ref)))
    print("KERNEL_OK")
</pallas_src>

<mosaic_0001>
module attributes {stable_mosaic.version = 11 : i64} {
  func.func @_token_pos_embed_kernel(%arg0: i32, %arg1: memref<128x1xi32, #tpu.memory_space<vmem>>, %arg2: memref<32x128xf32, #tpu.memory_space<vmem>>, %arg3: memref<64x128xf32, #tpu.memory_space<vmem>>, %arg4: memref<2x64x128xf32, #tpu.memory_space<vmem>>) attributes {dimension_semantics = [#tpu.dimension_semantics<arbitrary>], iteration_bounds = array<i64: 1>, scalar_prefetch = 0 : i64, scratch_operands = 0 : i64, tpu.core_type = #tpu.core_type<tc>, window_params = [{pipeline_mode = #tpu.pipeline_mode<synchronous>, transform_indices = @transform_0, window_bounds = array<i64: 128, 1>}, {pipeline_mode = #tpu.pipeline_mode<synchronous>, transform_indices = @transform_1, window_bounds = array<i64: 32, 128>}, {pipeline_mode = #tpu.pipeline_mode<synchronous>, transform_indices = @transform_2, window_bounds = array<i64: 64, 128>}, {pipeline_mode = #tpu.pipeline_mode<synchronous>, transform_indices = @transform_3, window_bounds = array<i64: 2, 64, 128>}]} {
    %c0 = arith.constant 0 : index
    %c0_0 = arith.constant 0 : index
    %0 = vector.load %arg1[%c0, %c0_0] : memref<128x1xi32, #tpu.memory_space<vmem>>, vector<128x1xi32>
    %1 = tpu.iota {dimensions = array<i32: 1>} : vector<128x32xi32>
    %2 = vector.broadcast %0 : vector<128x1xi32> to vector<128x32xi32>
    %3 = arith.cmpi eq, %2, %1 : vector<128x32xi32>
    %4 = arith.extui %3 : vector<128x32xi1> to vector<128x32xi32>
    %5 = arith.sitofp %4 : vector<128x32xi32> to vector<128x32xf32>
    %c0_1 = arith.constant 0 : index
    %c0_2 = arith.constant 0 : index
    %6 = vector.load %arg2[%c0_1, %c0_2] : memref<32x128xf32, #tpu.memory_space<vmem>>, vector<32x128xf32>
    %cst = arith.constant dense<0.000000e+00> : vector<128x128xf32>
    %7 = tpu.matmul %5, %6, %cst {dimension_numbers = #tpu.dot_dimension_numbers<[1], [0], [0], [1], [0, 0, 1, 1], [], []>, precision = #tpu.contract_precision<fp32>} : vector<128x32xf32>, vector<32x128xf32>, vector<128x128xf32> -> vector<128x128xf32>
    %c0_3 = arith.constant 0 : index
    %c0_4 = arith.constant 0 : index
    %8 = vector.load %arg3[%c0_3, %c0_4] : memref<64x128xf32, #tpu.memory_space<vmem>>, vector<64x128xf32>
    %9 = vector.extract_strided_slice %7 {offsets = [0, 0], sizes = [64, 128], strides = [1, 1]} : vector<128x128xf32> to vector<64x128xf32>
    %10 = arith.addf %9, %8 : vector<64x128xf32>
    %c0_5 = arith.constant 0 : index
    %c0_6 = arith.constant 0 : index
    %c0_7 = arith.constant 0 : index
    %11 = vector.load %arg4[%c0_5, %c0_6, %c0_7] : memref<2x64x128xf32, #tpu.memory_space<vmem>>, vector<1x64x128xf32>
    %12 = vector.shape_cast %11 : vector<1x64x128xf32> to vector<64x128xf32>
    %13 = vector.shape_cast %10 : vector<64x128xf32> to vector<1x64x128xf32>
    tpu.vector_store %arg4[%c0_5, %c0_6, %c0_7], %13 {strides = array<i32>} : memref<2x64x128xf32, #tpu.memory_space<vmem>>, vector<1x64x128xf32>,
    %14 = vector.extract_strided_slice %7 {offsets = [64, 0], sizes = [64, 128], strides = [1, 1]} : vector<128x128xf32> to vector<64x128xf32>
    %15 = arith.addf %14, %8 : vector<64x128xf32>
    %c1 = arith.constant 1 : index
    %c0_8 = arith.constant 0 : index
    %c0_9 = arith.constant 0 : index
    %16 = vector.load %arg4[%c1, %c0_8, %c0_9] : memref<2x64x128xf32, #tpu.memory_space<vmem>>, vector<1x64x128xf32>
    %17 = vector.shape_cast %16 : vector<1x64x128xf32> to vector<64x128xf32>
    %18 = vector.shape_cast %15 : vector<64x128xf32> to vector<1x64x128xf32>
    tpu.vector_store %arg4[%c1, %c0_8, %c0_9], %18 {strides = array<i32>} : memref<2x64x128xf32, #tpu.memory_space<vmem>>, vector<1x64x128xf32>,
    return
  }
  func.func @transform_0(%arg0: i32) -> (i32, i32) {
    %c0_i32 = arith.constant 0 : i32
    %c0_i32_0 = arith.constant 0 : i32
    %c0_i32_1 = arith.constant 0 : i32
    return %c0_i32, %c0_i32_0 : i32, i32
  }
  func.func @transform_1(%arg0: i32) -> (i32, i32) {
    %c0_i32 = arith.constant 0 : i32
    %c0_i32_0 = arith.constant 0 : i32
    %c0_i32_1 = arith.constant 0 : i32
    return %c0_i32, %c0_i32_0 : i32, i32
  }
  func.func @transform_2(%arg0: i32) -> (i32, i32) {
    %c0_i32 = arith.constant 0 : i32
    %c0_i32_0 = arith.constant 0 : i32
    %c0_i32_1 = arith.constant 0 : i32
    return %c0_i32, %c0_i32_0 : i32, i32
  }
  func.func @transform_3(%arg0: i32) -> (i32, i32, i32) {
    %c0_i32 = arith.constant 0 : i32
    %c0_i32_0 = arith.constant 0 : i32
    %c0_i32_1 = arith.constant 0 : i32
    %c0_i32_2 = arith.constant 0 : i32
    return %c0_i32, %c0_i32_0, %c0_i32_1 : i32, i32, i32
  }
}

</mosaic_0001>

<bundles_post_ra>
// kernel: tpu_custom_call.1
= control target key start
LH: loop header
LB: loop body
LE: loop exit
PB: predicated region body
PF: predicated region fallthrough
CT: control target
= control target key end

     0   :  { %v1774_v2 = vmov 0   ;;  %s2467_s0 = inlined_call_operand.vmem [shape: s32[128,1], index: 0, kind: input, shape index: {}]   ;;  %s2468_s1 = inlined_call_operand.vmem [shape: f32[32,128], index: 1, kind: input, shape index: {}]   ;;  %s2469_s2 = inlined_call_operand.vmem [shape: f32[64,128], index: 2, kind: input, shape index: {}]   ;;  %s2470_s3 = inlined_call_operand.hbm [shape: f32[2,64,128], index: 3, kind: output, shape index: {}]  }
   0x1   :  { %v17_v0 = vld [vmem:[%s2467_s0 + $0x10] sm:$0xff]  ;;  %v15_v1 = vld [vmem:[%s2467_s0] sm:$0xff]  ;;  %1751 = vset.pattern.permute.xlu1 %v1774_v2  ;;  %1750 = vset.pattern.permute.xlu0 %v1774_v2  ;;  %v18_v3 = vld [vmem:[%s2467_s0 + $0x18] sm:$0xff] }
   0x2   :  { %40 = vperm.xlu1 %1751, %v17_v0   ;;  %34 = vperm.xlu0 %1750, %v15_v1   ;;  %v16_v4 = vld [vmem:[%s2467_s0 + $0x8] sm:$0xff]  ;;  %v132_v5 = vld [vmem:[%s2468_s1 + $0x18] sm:$0xff]  ;;  %v131_v6 = vld [vmem:[%s2468_s1 + $0x10] sm:$0xff] }
   0x3   :  { %v1817_v7 = vand.u32 4294901760, %v132_v5  ;;  %v1819_v8 = vand.u32 4294901760, %v131_v6  ;;  %v130_v9 = vld [vmem:[%s2468_s1 + $0x8] sm:$0xff]  ;;  %v129_v10 = vld [vmem:[%s2468_s1] sm:$0xff] }
   0x6   :  { %43 = vperm.xlu1 %1751, %v18_v3   ;;  %37 = vperm.xlu0 %1750, %v16_v4  }
   0x7   :  { %8 = vsyncpa [#allocation3], 0  ;;  %v20_v11 = vld [vmem:[%s2467_s0 + $0x28] sm:$0xff]  ;;  %v19_v12 = vld [vmem:[%s2467_s0 + $0x20] sm:$0xff]  ;;  %v1833_v13 = vand.u32 4294901760, %v130_v9  ;;  %v1835_v14 = vand.u32 4294901760, %v129_v10  ;;  %v1838_v15 = vsub.f32 %v132_v5, %v1817_v7  ;;  %v1841_v16 = vsub.f32 %v131_v6, %v1819_v8  ;;  %1553 = vmatprep.subr.mxu0 %v1817_v7 }
   0x8   :  { %1554 = vmatpush3.msra.mxu0 %v1817_v7  ;;  %v22_v21 = vld [vmem:[%s2467_s0 + $0x38] sm:$0xff]  ;;  %v21_v22 = vld [vmem:[%s2467_s0 + $0x30] sm:$0xff]  ;;  %v24_v29 = vld [vmem:[%s2467_s0 + $0x48] sm:$0xff]  ;;  %v31_v41 = vlaneseq  ;;  %vm133_vm0 = vcmask 261120   ;;  %v1775_v45 = vmov 0.0  }
   0x9   :  { %v1845_v17 = vsub.f32 %v130_v9, %v1833_v13  ;;  %v1848_v18 = vsub.f32 %v129_v10, %v1835_v14  ;;  %v1852_v19 = vand.u32 4294901760, %v1838_v15  ;;  %v1855_v20 = vand.u32 4294901760, %v1841_v16  ;;  %1555 = vmatprep.subr.mxu0 %v1819_v8  ;;  %v23_v30 = vld [vmem:[%s2467_s0 + $0x40] sm:$0xff]  ;;  %v26_v34 = vld [vmem:[%s2467_s0 + $0x58] sm:$0xff]  ;;  %v25_v35 = vld [vmem:[%s2467_s0 + $0x50] sm:$0xff] }
   0xa   :  { %49 = vperm.xlu1 %1751, %v20_v11   ;;  %46 = vperm.xlu0 %1750, %v19_v12   ;;  %v28_v37 = vld [vmem:[%s2467_s0 + $0x68] sm:$0xff]  ;;  %v27_v38 = vld [vmem:[%s2467_s0 + $0x60] sm:$0xff]  ;;  %v30_v39 = vld [vmem:[%s2467_s0 + $0x78] sm:$0xff]  ;;  %v1909_v42 = vand.u32 127, %v31_v41 }
   0xb   :  { %v1864_v23 = vand.u32 4294901760, %v1845_v17  ;;  %v439_v24 = vsub.f32 %v1838_v15, %v1852_v19  ;;  %v446_v25 = vsub.f32 %v1841_v16, %v1855_v20  ;;  %v1872_v26 = vand.u32 4294901760, %v1848_v18  ;;  %1556 = vmatpush3.msra.mxu0 %v1819_v8  ;;  %v29_v40 = vld [vmem:[%s2467_s0 + $0x70] sm:$0xff] }
   0xc   :  { %1557 = vmatprep.subr.mxu0 %v1833_v13 }
   0xd   :  { %v453_v27 = vsub.f32 %v1845_v17, %v1864_v23  ;;  %v440_v28 = vand.u32 4294901760, %v439_v24  ;;  %v447_v31 = vand.u32 4294901760, %v446_v25  ;;  %1558 = vmatpush3.msra.mxu0 %v1833_v13  ;;  %v460_v32 = vsub.f32 %v1848_v18, %v1872_v26 }
   0xe   :  { %55 = vperm.xlu1 %1751, %v22_v21   ;;  %52 = vperm.xlu0 %1750, %v21_v22  }
   0xf   :  { %1585 = vmatprep.subr.mxu1 %v440_v28  ;;  %1559 = vmatprep.subr.mxu0 %v1835_v14  ;;  %v454_v33 = vand.u32 4294901760, %v453_v27  ;;  %v461_v36 = vand.u32 4294901760, %v460_v32 }
  0x10   :  { %1586 = vmatpush3.msra.mxu1 %v440_v28  ;;  %1560 = vmatpush3.msra.mxu0 %v1835_v14 }
  0x11   :  { %1587 = vmatprep.subr.mxu1 %v447_v31  ;;  %1617 = vmatprep.subr.mxu0 %v1838_v15 }
  0x12   :  { %61 = vperm.xlu1 %1751, %v24_v29   ;;  %58 = vperm.xlu0 %1750, %v23_v30  }
  0x13   :  { %1588 = vmatpush3.msra.mxu1 %v447_v31 }
  0x14   :  { %1589 = vmatprep.subr.mxu1 %v454_v33 }
  0x15   :  { %1590 = vmatpush3.msra.mxu1 %v454_v33 }
  0x16   :  { %67 = vperm.xlu1 %1751, %v26_v34   ;;  %64 = vperm.xlu0 %1750, %v25_v35  }
  0x17   :  { %1591 = vmatprep.subr.mxu1 %v461_v36 }
  0x18   :  { %1592 = vmatpush3.msra.mxu1 %v461_v36 }
  0x19   :  { %1649 = vmatprep.subr.mxu1 %v1817_v7 }
  0x1a   :  { %73 = vperm.xlu1 %1751, %v28_v37   ;;  %70 = vperm.xlu0 %1750, %v27_v38  }
  0x1e   :  { %79 = vperm.xlu1 %1751, %v30_v39   ;;  %76 = vperm.xlu0 %1750, %v29_v40  }
  0x7d   :  { %v41_v43 = vpop.permute.xlu1 %40  ;;  %v35_v44 = vpop.permute.xlu0 %34 }
  0x7e   :  { %vm83_vm1 = vcmp.eq.s32.totalorder %v41_v43, %v1909_v42  ;;  %vm81_vm2 = vcmp.eq.s32.totalorder %v35_v44, %v1909_v42 }
  0x7f   :  { %v1914_v46 = vsel %vm83_vm1, 1.0, %v1775_v45  ;;  %v1917_v47 = vsel %vm81_vm2, 1.0, %v1775_v45 }
  0x80   :  { %v141_v48 = vsel %vm133_vm0, %v1914_v46, 0  ;;  %1593 = vmatprep.mubr.msk.f32.mxu1 %vm133_vm0, %v1917_v47  ;;  %v135_v49 = vsel %vm133_vm0, %v1917_v47, 0 }
  0x81   :  { %v1925_v50 = vsub.f32 %v141_v48, %v141_v48  ;;  %v44_v51 = vpop.permute.xlu1 %43  ;;  %v38_v52 = vpop.permute.xlu0 %37  ;;  %v1927_v53 = vsub.f32 %v135_v49, %v135_v49 }
  0x82   :  { %vm84_vm3 = vcmp.eq.s32.totalorder %v44_v51, %v1909_v42  ;;  %vm82_vm4 = vcmp.eq.s32.totalorder %v38_v52, %v1909_v42 }
  0x83   :  { %v1932_v54 = vsel %vm84_vm3, 1.0, %v1775_v45  ;;  %v1935_v55 = vsel %vm82_vm4, 1.0, %v1775_v45  ;;  %v253_v56 = vand.u32 4294901760, %v1927_v53  ;;  %v273_v59 = vand.u32 4294901760, %v1925_v50 }
  0x84   :  { %v144_v57 = vsel %vm133_vm0, %v1932_v54, 0  ;;  %v138_v58 = vsel %vm133_vm0, %v1935_v55, 0  ;;  %1594 = vmatmul.mubr.msk.f32.vlgmr.msra.gmra.mxu1 %vm133_vm0, %v1935_v55 }
  0x85   :  { %v1945_v60 = vsub.f32 %v144_v57, %v144_v57  ;;  %v1947_v61 = vsub.f32 %v138_v58, %v138_v58  ;;  %v50_v62 = vpop.permute.xlu1 %49  ;;  %1596 = vmatprep.mubr.msk.f32.mxu1 %vm133_vm0, %v1914_v46  ;;  %v47_v63 = vpop.permute.xlu0 %46  ;;  %v254_v0 = vsub.f32 %v1927_v53, %v253_v56  ;;  %1650 = vmatpush3.msra.mxu1 %v1817_v7 }
  0x86   :  { %vm86_vm5 = vcmp.eq.s32.totalorder %v50_v62, %v1909_v42  ;;  %vm85_vm6 = vcmp.eq.s32.totalorder %v47_v63, %v1909_v42  ;;  %1651 = vmatprep.subr.mxu1 %v1819_v8  ;;  %v274_v9 = vsub.f32 %v1925_v50, %v273_v59 }
  0x87   :  { %v1958_v1 = vsel %vm86_vm5, 1.0, %v1775_v45  ;;  %v1961_v2 = vsel %vm85_vm6, 1.0, %v1775_v45  ;;  %v255_v3 = vand.u32 4294901760, %v254_v0  ;;  %v263_v4 = vand.u32 4294901760, %v1947_v61  ;;  %1652 = vmatpush3.msra.mxu1 %v1819_v8 }
  0x88   :  { %v150_v5 = vsel %vm133_vm0, %v1958_v1, 0  ;;  %v147_v6 = vsel %vm133_vm0, %v1961_v2, 0  ;;  %1597 = vmatmul.mubr.msk.f32.gmra.mxu1 %vm133_vm0, %v1932_v54  ;;  %v283_v10 = vand.u32 4294901760, %v1945_v60  ;;  %1653 = vmatprep.subr.mxu1 %v1833_v13  ;;  %v275_v33 = vand.u32 4294901760, %v274_v9 }
  0x89   :  { %v1975_v11 = vsub.f32 %v150_v5, %v150_v5  ;;  %v1977_v12 = vsub.f32 %v147_v6, %v147_v6  ;;  %v56_v21 = vpop.permute.xlu1 %55  ;;  %1561 = vmatprep.mubr.f32.mxu0 %v255_v3  ;;  %1599 = vmatprep.mubr.msk.f32.mxu1 %vm133_vm0, %v1961_v2  ;;  %v53_v22 = vpop.permute.xlu0 %52  ;;  %v264_v24 = vsub.f32 %v1947_v61, %v263_v4 }
  0x8a   :  { %vm88_vm7 = vcmp.eq.s32.totalorder %v56_v21, %v1909_v42  ;;  %vm87_vm8 = vcmp.eq.s32.totalorder %v53_v22, %v1909_v42  ;;  %v284_v25 = vsub.f32 %v1945_v60, %v283_v10  ;;  %1654 = vmatpush3.msra.mxu1 %v1833_v13 }
  0x8b   :  { %v1991_v27 = vsel %vm88_vm7, 1.0, %v1775_v45  ;;  %v1994_v28 = vsel %vm87_vm8, 1.0, %v1775_v45  ;;  %v265_v29 = vand.u32 4294901760, %v264_v24  ;;  %v293_v30 = vand.u32 4294901760, %v1977_v12  ;;  %1655 = vmatprep.subr.mxu1 %v1835_v14 }
  0x8c   :  { %v156_v31 = vsel %vm133_vm0, %v1991_v27, 0  ;;  %v153_v32 = vsel %vm133_vm0, %v1994_v28, 0  ;;  %1600 = vmatmul.mubr.msk.f32.gmra.mxu1 %vm133_vm0, %v1958_v1  ;;  %v303_v34 = vand.u32 4294901760, %v1975_v11  ;;  %v285_v40 = vand.u32 4294901760, %v284_v25 }
  0x8d   :  { %v2005_v35 = vsub.f32 %v156_v31, %v156_v31  ;;  %v2007_v36 = vsub.f32 %v153_v32, %v153_v32  ;;  %v62_v37 = vpop.permute.xlu1 %61  ;;  %1562 = vmatmul.mubr.f32.vlgmr.msra.gmra.mxu0 %v265_v29  ;;  %1602 = vmatprep.mubr.msk.f32.mxu1 %vm133_vm0, %v1994_v28  ;;  %v59_v38 = vpop.permute.xlu0 %58  ;;  %v294_v39 = vsub.f32 %v1977_v12, %v293_v30 }
  0x8e   :  { %vm90_vm9 = vcmp.eq.s32.totalorder %v62_v37, %v1909_v42  ;;  %1618 = vmatpush3.msra.mxu0 %v1838_v15  ;;  %vm89_vm10 = vcmp.eq.s32.totalorder %v59_v38, %v1909_v42  ;;  %1564 = vmatprep.mubr.f32.mxu0 %v275_v33  ;;  %v304_v41 = vsub.f32 %v1975_v11, %v303_v34 }
  0x8f   :  { %v2021_v43 = vsel %vm90_vm9, 1.0, %v1775_v45  ;;  %v2024_v44 = vsel %vm89_vm10, 1.0, %v1775_v45  ;;  %v295_v48 = vand.u32 4294901760, %v294_v39  ;;  %1619 = vmatprep.subr.mxu0 %v1841_v16  ;;  %v313_v49 = vand.u32 4294901760, %v2007_v36  ;;  %1656 = vmatpush3.msra.mxu1 %v1835_v14 }
  0x90   :  { %v162_v15 = vsel %vm133_vm0, %v2021_v43, 0  ;;  %v159_v51 = vsel %vm133_vm0, %v2024_v44, 0  ;;  %1603 = vmatmul.mubr.msk.f32.gmra.mxu1 %vm133_vm0, %v1991_v27  ;;  %1620 = vmatpush3.msra.mxu0 %v1841_v16  ;;  %v323_v52 = vand.u32 4294901760, %v2005_v35  ;;  %v305_v16 = vand.u32 4294901760, %v304_v41 }
  0x91   :  { %v2037_v57 = vsub.f32 %v162_v15, %v162_v15  ;;  %v2039_v58 = vsub.f32 %v159_v51, %v159_v51  ;;  %v68_v62 = vpop.permute.xlu1 %67  ;;  %1565 = vmatmul.mubr.f32.gmra.mxu0 %v285_v40  ;;  %1605 = vmatprep.mubr.msk.f32.mxu1 %vm133_vm0, %v2024_v44  ;;  %v65_v63 = vpop.permute.xlu0 %64  ;;  %v314_v0 = vsub.f32 %v2007_v36, %v313_v49 }
  0x92   :  { %vm92_vm11 = vcmp.eq.s32.totalorder %v68_v62, %v1909_v42  ;;  %vm91_vm12 = vcmp.eq.s32.totalorder %v65_v63, %v1909_v42  ;;  %1567 = vmatprep.mubr.f32.mxu0 %v295_v48  ;;  %v324_v3 = vsub.f32 %v2005_v35, %v323_v52  ;;  %1621 = vmatprep.subr.mxu0 %v1845_v17 }
  0x93   :  { %v2053_v5 = vsel %vm92_vm11, 1.0, %v1775_v45  ;;  %v2056_v6 = vsel %vm91_vm12, 1.0, %v1775_v45  ;;  %v315_v9 = vand.u32 4294901760, %v314_v0  ;;  %v333_v21 = vand.u32 4294901760, %v2039_v58  ;;  %1622 = vmatpush3.msra.mxu0 %v1845_v17  ;;  %1713 = vmatprep.subr.mxu1 %v1817_v7 }
  0x94   :  { %v168_v22 = vsel %vm133_vm0, %v2053_v5, 0  ;;  %v165_v24 = vsel %vm133_vm0, %v2056_v6, 0  ;;  %1606 = vmatmul.mubr.msk.f32.gmra.mxu1 %vm133_vm0, %v2021_v43  ;;  %v343_v25 = vand.u32 4294901760, %v2037_v57  ;;  %1623 = vmatprep.subr.mxu0 %v1848_v18  ;;  %v325_v37 = vand.u32 4294901760, %v324_v3 }
  0x95   :  { %v2069_v29 = vsub.f32 %v168_v22, %v168_v22  ;;  %v2071_v31 = vsub.f32 %v165_v24, %v165_v24  ;;  %v74_v17 = vpop.permute.xlu1 %73  ;;  %1568 = vmatmul.mubr.f32.gmra.mxu0 %v305_v16  ;;  %1608 = vmatprep.mubr.msk.f32.mxu1 %vm133_vm0, %v2056_v6  ;;  %v71_v32 = vpop.permute.xlu0 %70  ;;  %v334_v33 = vsub.f32 %v2039_v58, %v333_v21 }
  0x96   :  { %vm94_vm13 = vcmp.eq.s32.totalorder %v74_v17, %v1909_v42  ;;  %vm93_vm14 = vcmp.eq.s32.totalorder %v71_v32, %v1909_v42  ;;  %1570 = vmatprep.mubr.f32.mxu0 %v315_v9  ;;  %v344_v38 = vsub.f32 %v2037_v57, %v343_v25  ;;  %1624 = vmatpush3.msra.mxu0 %v1848_v18 }
  0x97   :  { %v2085_v39 = vsel %vm94_vm13, 1.0, %v1775_v45  ;;  %v2088_v40 = vsel %vm93_vm14, 1.0, %v1775_v45  ;;  %v335_v41 = vand.u32 4294901760, %v334_v33  ;;  %v353_v48 = vand.u32 4294901760, %v2071_v31  ;;  %1681 = vmatprep.subr.mxu0 %v1852_v19 }
  0x98   :  { %v174_v15 = vsel %vm133_vm0, %v2085_v39, 0  ;;  %v171_v51 = vsel %vm133_vm0, %v2088_v40, 0  ;;  %1609 = vmatmul.mubr.msk.f32.gmra.mxu1 %vm133_vm0, %v2053_v5  ;;  %v2471_v62 = vand.u32 4294901760, %v2069_v29  ;;  %v345_v9 = vand.u32 4294901760, %v344_v38 }
  0x99   :  { %v2101_v63 = vsub.f32 %v174_v15, %v174_v15  ;;  %v2103_v0 = vsub.f32 %v171_v51, %v171_v51  ;;  %v80_v18 = vpop.permute.xlu1 %79  ;;  %1571 = vmatmul.mubr.f32.gmra.mxu0 %v325_v37  ;;  %1611 = vmatprep.mubr.msk.f32.mxu1 %vm133_vm0, %v2088_v40  ;;  %v77_v16 = vpop.permute.xlu0 %76  ;;  %v354_v3 = vsub.f32 %v2071_v31, %v353_v48 }
  0x9a   :  { %vm96_vm15 = vcmp.eq.s32.totalorder %v80_v18, %v1909_v42  ;;  %vm95_vm1 = vcmp.eq.s32.totalorder %v77_v16, %v1909_v42  ;;  %1573 = vmatprep.mubr.f32.mxu0 %v335_v41  ;;  %v364_v22 = vsub.f32 %v2069_v29, %v2471_v62 }
  0x9b   :  { %v2116_v24 = vsel %vm96_vm15, 1.0, %v1775_v45  ;;  %v2119_v17 = vsel %vm95_vm1, 1.0, %v1775_v45  ;;  %v355_v32 = vand.u32 4294901760, %v354_v3  ;;  %v373_v33 = vand.u32 4294901760, %v2103_v0 }
  0x9c   :  { %v180_v37 = vsel %vm133_vm0, %v2116_v24, 0  ;;  %v177_v42 = vsel %vm133_vm0, %v2119_v17, 0  ;;  %1612 = vmatmul.mubr.msk.f32.gmra.mxu1 %vm133_vm0, %v2085_v39  ;;  %v383_v38 = vand.u32 4294901760, %v2101_v63  ;;  %v365_v51 = vand.u32 4294901760, %v364_v22 }
  0x9d   :  { %v2129_v41 = vsub.f32 %v180_v37, %v180_v37  ;;  %v2131_v15 = vsub.f32 %v177_v42, %v177_v42  ;;  %1574 = vmatmul.mubr.f32.gmra.mxu0 %v345_v9  ;;  %1614 = vmatprep.mubr.msk.f32.mxu1 %vm133_vm0, %v2119_v17  ;;  %v374_v45 = vsub.f32 %v2103_v0, %v373_v33 }
  0x9e   :  { %1576 = vmatprep.mubr.f32.mxu0 %v355_v32  ;;  %v384_v16 = vsub.f32 %v2101_v63, %v383_v38 }
  0x9f   :  { %v375_v18 = vand.u32 4294901760, %v374_v45  ;;  %v393_v3 = vand.u32 4294901760, %v2131_v15  ;;  %v403_v62 = vand.u32 4294901760, %v2129_v41 }
  0xa0   :  { %1615 = vmatmul.mubr.msk.f32.gmra.mxu1 %vm133_vm0, %v2116_v24  ;;  %v385_v37 = vand.u32 4294901760, %v384_v16 }
  0xa1   :  { %1577 = vmatmul.mubr.f32.gmra.mxu0 %v365_v51  ;;  %1657 = vmatprep.mubr.f32.mxu1 %v253_v56  ;;  %v394_v9 = vsub.f32 %v2131_v15, %v393_v3  ;;  %v404_v22 = vsub.f32 %v2129_v41, %v403_v62 }
  0xa2   :  { %1579 = vmatprep.mubr.f32.mxu0 %v375_v18 }
  0xa3   :  { %v395_v32 = vand.u32 4294901760, %v394_v9  ;;  %v405_v42 = vand.u32 4294901760, %v404_v22 }
  0xa4   :  { %1658 = vmatmul.mubr.f32.vlgmr.msra.gmra.mxu1 %v263_v4 }
  0xa5   :  { %1580 = vmatmul.mubr.f32.gmra.mxu0 %v385_v37  ;;  %1660 = vmatprep.mubr.f32.mxu1 %v273_v59 }
  0xa6   :  { %1582 = vmatprep.mubr.f32.mxu0 %v395_v32  ;;  %1714 = vmatpush3.msra.mxu1 %v1817_v7  ;;  %v2472_v7 = vand.u32 4294901760, %v2069_v29 }
  0xa7   :  { %1715 = vmatprep.subr.mxu1 %v1819_v8 }
  0xa8   :  { %1661 = vmatmul.mubr.f32.gmra.mxu1 %v283_v10 }
  0xa9   :  { %1583 = vmatmul.mubr.f32.gmra.mxu0 %v405_v42  ;;  %1663 = vmatprep.mubr.f32.mxu1 %v293_v30 }
  0xaa   :  { %1625 = vmatprep.mubr.f32.mxu0 %v1927_v53  ;;  %1716 = vmatpush3.msra.mxu1 %v1819_v8 }
  0xab   :  { %1717 = vmatprep.subr.mxu1 %v1833_v13 }
  0xac   :  { %1664 = vmatmul.mubr.f32.gmra.mxu1 %v303_v34 }
  0xad   :  { %1626 = vmatmul.mubr.f32.vlgmr.msra.gmra.mxu0 %v1947_v61  ;;  %1666 = vmatprep.mubr.f32.mxu1 %v313_v49 }
  0xae   :  { %1682 = vmatpush3.msra.mxu0 %v1852_v19  ;;  %1628 = vmatprep.mubr.f32.mxu0 %v1925_v50 }
  0xaf   :  { %1683 = vmatprep.subr.mxu0 %v1855_v20  ;;  %1718 = vmatpush3.msra.mxu1 %v1833_v13 }
  0xb0   :  { %1667 = vmatmul.mubr.f32.gmra.mxu1 %v323_v52  ;;  %1684 = vmatpush3.msra.mxu0 %v1855_v20 }
  0xb1   :  { %1629 = vmatmul.mubr.f32.gmra.mxu0 %v1945_v60  ;;  %1669 = vmatprep.mubr.f32.mxu1 %v333_v21 }
  0xb2   :  { %1631 = vmatprep.mubr.f32.mxu0 %v1977_v12  ;;  %1685 = vmatprep.subr.mxu0 %v1864_v23 }
  0xb3   :  { %1686 = vmatpush3.msra.mxu0 %v1864_v23  ;;  %1719 = vmatprep.subr.mxu1 %v1835_v14 }
  0xb4   :  { %1670 = vmatmul.mubr.f32.gmra.mxu1 %v343_v25  ;;  %1687 = vmatprep.subr.mxu0 %v1872_v26 }
  0xb5   :  { %1632 = vmatmul.mubr.f32.gmra.mxu0 %v1975_v11  ;;  %1672 = vmatprep.mubr.f32.mxu1 %v353_v48 }
  0xb6   :  { %1634 = vmatprep.mubr.f32.mxu0 %v2007_v36  ;;  %1720 = vmatpush3.msra.mxu1 %v1835_v14 }
  0xb7   :  { %1688 = vmatpush3.msra.mxu0 %v1872_v26 }
  0xb8   :  { %1673 = vmatmul.mubr.f32.gmra.mxu1 %v2472_v7 }
  0xb9   :  { %1635 = vmatmul.mubr.f32.gmra.mxu0 %v2005_v35  ;;  %1675 = vmatprep.mubr.f32.mxu1 %v373_v33 }
  0xba   :  { %1637 = vmatprep.mubr.f32.mxu0 %v2039_v58 }
  0xbc   :  { %1676 = vmatmul.mubr.f32.gmra.mxu1 %v383_v38 }
  0xbd   :  { %1638 = vmatmul.mubr.f32.gmra.mxu0 %v2037_v57  ;;  %1678 = vmatprep.mubr.f32.mxu1 %v393_v3 }
  0xbe   :  { %1640 = vmatprep.mubr.f32.mxu0 %v2071_v31 }
  0xc0   :  { %1679 = vmatmul.mubr.f32.gmra.mxu1 %v403_v62 }
  0xc1   :  { %1641 = vmatmul.mubr.f32.gmra.mxu0 %v2069_v29  ;;  %1721 = vmatprep.mubr.msk.f32.mxu1 %vm133_vm0, %v1917_v47 }
  0xc2   :  { %1643 = vmatprep.mubr.f32.mxu0 %v2103_v0 }
  0xc4   :  { %1722 = vmatmul.mubr.msk.f32.vlgmr.msra.gmra.mxu1 %vm133_vm0, %v1935_v55 }
  0xc5   :  { %1644 = vmatmul.mubr.f32.gmra.mxu0 %v2101_v63  ;;  %1724 = vmatprep.mubr.msk.f32.mxu1 %vm133_vm0, %v1914_v46 }
  0xc6   :  { %1646 = vmatprep.mubr.f32.mxu0 %v2131_v15 }
  0xc8   :  { %1725 = vmatmul.mubr.msk.f32.gmra.mxu1 %vm133_vm0, %v1932_v54 }
  0xc9   :  { %1647 = vmatmul.mubr.f32.gmra.mxu0 %v2129_v41  ;;  %1727 = vmatprep.mubr.msk.f32.mxu1 %vm133_vm0, %v1961_v2 }
  0xca   :  { %1689 = vmatprep.mubr.msk.f32.mxu0 %vm133_vm0, %v1917_v47 }
  0xcc   :  { %1728 = vmatmul.mubr.msk.f32.gmra.mxu1 %vm133_vm0, %v1958_v1 }
  0xcd   :  { %1690 = vmatmul.mubr.msk.f32.vlgmr.msra.gmra.mxu0 %vm133_vm0, %v1935_v55  ;;  %1730 = vmatprep.mubr.msk.f32.mxu1 %vm133_vm0, %v1994_v28 }
  0xce   :  { %1692 = vmatprep.mubr.msk.f32.mxu0 %vm133_vm0, %v1914_v46 }
  0xd0   :  { %1731 = vmatmul.mubr.msk.f32.gmra.mxu1 %vm133_vm0, %v1991_v27 }
  0xd1   :  { %1693 = vmatmul.mubr.msk.f32.gmra.mxu0 %vm133_vm0, %v1932_v54  ;;  %1733 = vmatprep.mubr.msk.f32.mxu1 %vm133_vm0, %v2024_v44 }
  0xd2   :  { %1695 = vmatprep.mubr.msk.f32.mxu0 %vm133_vm0, %v1961_v2 }
  0xd4   :  { %1734 = vmatmul.mubr.msk.f32.gmra.mxu1 %vm133_vm0, %v2021_v43 }
  0xd5   :  { %1696 = vmatmul.mubr.msk.f32.gmra.mxu0 %vm133_vm0, %v1958_v1  ;;  %1736 = vmatprep.mubr.msk.f32.mxu1 %vm133_vm0, %v2056_v6 }
  0xd6   :  { %1698 = vmatprep.mubr.msk.f32.mxu0 %vm133_vm0, %v1994_v28 }
  0xd8   :  { %1737 = vmatmul.mubr.msk.f32.gmra.mxu1 %vm133_vm0, %v2053_v5 }
  0xd9   :  { %1699 = vmatmul.mubr.msk.f32.gmra.mxu0 %vm133_vm0, %v1991_v27  ;;  %1739 = vmatprep.mubr.msk.f32.mxu1 %vm133_vm0, %v2088_v40 }
  0xda   :  { %1701 = vmatprep.mubr.msk.f32.mxu0 %vm133_vm0, %v2024_v44 }
  0xdc   :  { %1740 = vmatmul.mubr.msk.f32.gmra.mxu1 %vm133_vm0, %v2085_v39 }
  0xdd   :  { %1702 = vmatmul.mubr.msk.f32.gmra.mxu0 %vm133_vm0, %v2021_v43  ;;  %1742 = vmatprep.mubr.msk.f32.mxu1 %vm133_vm0, %v2119_v17 }
  0xde   :  { %1704 = vmatprep.mubr.msk.f32.mxu0 %vm133_vm0, %v2056_v6 }
  0xe0   :  { %1743 = vmatmul.mubr.msk.f32.gmra.mxu1 %vm133_vm0, %v2116_v24 }
  0xe1   :  { %1705 = vmatmul.mubr.msk.f32.gmra.mxu0 %vm133_vm0, %v2053_v5 }
  0xe2   :  { %1707 = vmatprep.mubr.msk.f32.mxu0 %vm133_vm0, %v2088_v40 }
  0xe5   :  { %1708 = vmatmul.mubr.msk.f32.gmra.mxu0 %vm133_vm0, %v2085_v39 }
  0xe6   :  { %1710 = vmatprep.mubr.msk.f32.mxu0 %vm133_vm0, %v2119_v17 }
  0xe9   :  { %1711 = vmatmul.mubr.msk.f32.gmra.mxu0 %vm133_vm0, %v2116_v24 }
 0x144   :  { %v1595_v8 = vpop.f32.mrf.mxu1 }
 0x146   :  { %v2261_v13 = vpop.f32.mrf.mxu1 }
 0x148   :  { %v2263_v14 = vpop.f32.mrf.mxu1 }
 0x14a   :  { %v2265_v19 = vpop.f32.mrf.mxu1 }
 0x14c   :  { %v2267_v20 = vpop.f32.mrf.mxu1 }
 0x14d   :  { %v1563_v23 = vpop.f32.mrf.mxu0 }
 0x14e   :  { %v2269_v26 = vpop.f32.mrf.mxu1  ;;  %v505_v42 = vadd.f32 %v1595_v8, %v1563_v23 }
 0x14f   :  { %v257_v46 = vpop.f32.mrf.mxu0 }
 0x150   :  { %v2271_v47 = vpop.f32.mrf.mxu1 }
 0x151   :  { %v1566_v50 = vpop.f32.mrf.mxu0 }
 0x152   :  { %v2273_v53 = vpop.f32.mrf.mxu1 }
 0x153   :  { %v277_v54 = vpop.f32.mrf.mxu0 }
 0x154   :  { %v2275_v55 = vpop.f32.mrf.mxu1 }
 0x155   :  { %v2277_v56 = vpop.f32.mrf.mxu0 }
 0x156   :  { %v2279_v59 = vpop.f32.mrf.mxu1  ;;  %v529_v23 = vadd.f32 %v2267_v20, %v2277_v56 }
 0x157   :  { %v2281_v60 = vpop.f32.mrf.mxu0 }
 0x158   :  { %v2283_v61 = vpop.f32.mrf.mxu1 }
 0x159   :  { %v2285_v1 = vpop.f32.mrf.mxu0 }
 0x15a   :  { %v2287_v2 = vpop.f32.mrf.mxu1  ;;  %v541_v20 = vadd.f32 %v2271_v47, %v2285_v1  ;;  %v2385_v47 = vld [vmem:[%s2469_s2 + $0x18] sm:$0xff] }
 0x15b   :  { %v2289_v4 = vpop.f32.mrf.mxu0 }
 0x15c   :  { %v2291_v10 = vpop.f32.mrf.mxu1 }
 0x15d   :  { %v2293_v11 = vpop.f32.mrf.mxu0 }
 0x15e   :  { %v2295_v12 = vpop.f32.mrf.mxu1 }
 0x15f   :  { %2473 = vst [vmem:[#allocation5_spill] sm:$0xff] %v2295_v12  ;;  %v2297_v27 = vpop.f32.mrf.mxu0 }
 0x160   :  { %v2299_v28 = vpop.f32.mrf.mxu1 }
 0x161   :  { %2474 = vst [vmem:[#allocation6_spill] sm:$0xff] %v2299_v28  ;;  %v2301_v30 = vpop.f32.mrf.mxu0 }
 0x162   :  { %v2303_v34 = vpop.f32.mrf.mxu1 }
 0x163   :  { %2475 = vst [vmem:[#allocation7_spill] sm:$0xff] %v2303_v34  ;;  %v2305_v35 = vpop.f32.mrf.mxu0  ;;  %v499_v34 = vadd.f32 %v2261_v13, %v257_v46 }
 0x164   :  { %v1659_v36 = vpop.f32.mrf.mxu1 }
 0x165   :  { %v2307_v43 = vpop.f32.mrf.mxu0 }
 0x166   :  { %v850_v44 = vpop.f32.mrf.mxu1 }
 0x167   :  { %v2309_v49 = vpop.f32.mrf.mxu0 }
 0x168   :  { %v1662_v52 = vpop.f32.mrf.mxu1 }
 0x169   :  { %v2311_v57 = vpop.f32.mrf.mxu0 }
 0x16a   :  { %2476 = vst [vmem:[#allocation8_spill] sm:$0xff] %v2311_v57  ;;  %v2313_v58 = vpop.f32.mrf.mxu1 }
 0x16b   :  { %v2315_v5 = vpop.f32.mrf.mxu0 }
 0x16c   :  { %2477 = vst [vmem:[#allocation9_spill] sm:$0xff] %v2315_v5  ;;  %v2317_v6 = vpop.f32.mrf.mxu1 }
 0x16d   :  { %v1627_v21 = vpop.f32.mrf.mxu0 }
 0x16e   :  { %v2319_v25 = vpop.f32.mrf.mxu1 }
 0x16f   :  { %v668_v29 = vpop.f32.mrf.mxu0 }
 0x170   :  { %v2321_v31 = vpop.f32.mrf.mxu1  ;;  %v669_v28 = vadd.f32 %v668_v29, %v499_v34  ;;  %v2369_v34 = vld [vmem:[%s2469_s2 + $0x8] sm:$0xff] }
 0x171   :  { %v1630_v39 = vpop.f32.mrf.mxu0 }
 0x172   :  { %v2323_v40 = vpop.f32.mrf.mxu1 }
 0x173   :  { %v682_v48 = vpop.f32.mrf.mxu0 }
 0x174   :  { %v2325_v62 = vpop.f32.mrf.mxu1 }
 0x175   :  { %v1633_v63 = vpop.f32.mrf.mxu0 }
 0x176   :  { %v2327_v0 = vpop.f32.mrf.mxu1 }
 0x177   :  { %v696_v24 = vpop.f32.mrf.mxu0 }
 0x178   :  { %v2329_v17 = vpop.f32.mrf.mxu1 }
 0x179   :  { %2478 = vst [vmem:[#allocation10_spill] sm:$0xff] %v2329_v17  ;;  %v1636_v33 = vpop.f32.mrf.mxu0  ;;  %v511_v17 = vadd.f32 %v2265_v19, %v277_v54 }
 0x17a   :  { %v2331_v38 = vpop.f32.mrf.mxu1 }
 0x17b   :  { %2479 = vst [vmem:[#allocation11_spill] sm:$0xff] %v2331_v38  ;;  %v2333_v41 = vpop.f32.mrf.mxu0  ;;  %v683_v13 = vadd.f32 %v682_v48, %v511_v17 }
 0x17c   :  { %v2335_v15 = vpop.f32.mrf.mxu1 }
 0x17d   :  { %2480 = vst [vmem:[#allocation12_spill] sm:$0xff] %v2335_v15  ;;  %v2337_v45 = vpop.f32.mrf.mxu0  ;;  %v867_v17 = vadd.f32 %v2313_v58, %v683_v13  ;;  %v553_v58 = vadd.f32 %v2275_v55, %v2293_v11  ;;  %v547_v13 = vadd.f32 %v2279_v59, %v2297_v27  ;;  %v2405_v11 = vld [vmem:[%s2469_s2 + $0x28] sm:$0xff]  ;;  %v2415_v27 = vld [vmem:[%s2469_s2 + $0x20] sm:$0xff] }
 0x17e   :  { %v2339_v51 = vpop.f32.mrf.mxu1 }
 0x17f   :  { %2481 = vst [vmem:[#allocation13_spill] sm:$0xff] %v2339_v51  ;;  %v2341_v18 = vpop.f32.mrf.mxu0  ;;  %v676_v51 = vadd.f32 %v1627_v21, %v505_v42  ;;  %v851_v42 = vadd.f32 %v850_v44, %v669_v28  ;;  %v2376_v28 = vld [vmem:[%s2469_s2] sm:$0xff]  ;;  %v732_v55 = vadd.f32 %v2337_v45, %v553_v58 }
 0x180   :  { %v2343_v16 = vpop.f32.mrf.mxu1  ;;  %v725_v59 = vadd.f32 %v2341_v18, %v547_v13  ;;  %v2493_v13 = vld [vmem:[#allocation9_spill] sm:$0xff] }
 0x181   :  { %2482 = vst [vmem:[#allocation14_spill] sm:$0xff] %v2343_v16  ;;  %v2345_v3 = vpop.f32.mrf.mxu0  ;;  %v517_v16 = vadd.f32 %v2263_v14, %v1566_v50  ;;  %v859_v8 = vadd.f32 %v1659_v36, %v676_v51  ;;  %v523_v14 = vadd.f32 %v2269_v26, %v2281_v60  ;;  %v704_v50 = vadd.f32 %v1633_v63, %v529_v23 }
 0x182   :  { %v2347_v9 = vpop.f32.mrf.mxu1  ;;  %v923_v18 = vadd.f32 %v2325_v62, %v732_v55  ;;  %v2494_v55 = vld [vmem:[#allocation7_spill] sm:$0xff] }
 0x183   :  { %2483 = vst [vmem:[#allocation15_spill] sm:$0xff] %v2347_v9  ;;  %v2349_v37 = vpop.f32.mrf.mxu0  ;;  %v690_v12 = vadd.f32 %v1630_v39, %v517_v16  ;;  %v697_v56 = vadd.f32 %v696_v24, %v523_v14  ;;  %v718_v24 = vadd.f32 %v1636_v33, %v541_v20  ;;  %v565_v14 = vadd.f32 %v2283_v61, %v2301_v30  ;;  %v2424_v61 = vld [vmem:[%s2469_s2 + $0x38] sm:$0xff] }
 0x184   :  { %v1723_v32 = vpop.f32.mrf.mxu1 }
 0x185   :  { %v2351_v22 = vpop.f32.mrf.mxu0  ;;  %v875_v39 = vadd.f32 %v1662_v52, %v690_v12  ;;  %v535_v12 = vadd.f32 %v2273_v53, %v2289_v4  ;;  %v891_v52 = vadd.f32 %v2317_v6, %v704_v50  ;;  %v2394_v53 = vld [vmem:[%s2469_s2 + $0x10] sm:$0xff] }
 0x186   :  { %2484 = vst [vmem:[#allocation16_spill] sm:$0xff] %v2351_v22  ;;  %v1218_v7 = vpop.f32.mrf.mxu1 }
 0x187   :  { %v2353_v15 = vpop.f32.mrf.mxu0  ;;  %v711_v6 = vadd.f32 %v2333_v41, %v535_v12 }
 0x188   :  { %2485 = vst [vmem:[#allocation17_spill] sm:$0xff] %v2353_v15  ;;  %v1726_v5 = vpop.f32.mrf.mxu1 }
 0x189   :  { %v2356_v38 = vpop.f32.mrf.mxu0 }
 0x18a   :  { %v1230_v57 = vpop.f32.mrf.mxu1 }
 0x18b   :  { %v2359_v9 = vpop.f32.mrf.mxu0 }
 0x18c   :  { %v1729_v22 = vpop.f32.mrf.mxu1 }
 0x18d   :  { %v1691_v15 = vpop.f32.mrf.mxu0 }
 0x18e   :  { %v1060_v46 = vadd.f32 %v1691_v15, %v859_v8  ;;  %v1242_v21 = vpop.f32.mrf.mxu1 }
 0x18f   :  { %v1053_v19 = vpop.f32.mrf.mxu0  ;;  %v2491_v58 = vld [vmem:[#allocation17_spill] sm:$0xff] }
 0x190   :  { %v1225_v54 = vadd.f32 %v1723_v32, %v1060_v46  ;;  %v1054_v36 = vadd.f32 %v1053_v19, %v851_v42  ;;  %v1732_v29 = vpop.f32.mrf.mxu1 }
 0x191   :  { %v1694_v26 = vpop.f32.mrf.mxu0 }
 0x192   :  { %v1321_v60 = vadd.f32 %v2369_v34, %v1225_v54  ;;  %v1219_v44 = vadd.f32 %v1218_v7, %v1054_v36  ;;  %v1072_v48 = vadd.f32 %v1694_v26, %v875_v39  ;;  %v1254_v63 = vpop.f32.mrf.mxu1  ;;  %v883_v7 = vadd.f32 %v2319_v25, %v697_v56 }
 0x193   :  { %v1065_v1 = vpop.f32.mrf.mxu0  ;;  %v899_v36 = vadd.f32 %v2323_v40, %v711_v6  ;;  %v746_v39 = vadd.f32 %v2345_v3, %v565_v14  ;;  %v577_v40 = vadd.f32 %v2291_v10, %v2307_v43  ;;  %v2487_v10 = vld [vmem:[#allocation16_spill] sm:$0xff] }
 0x194   :  { %1329 = vst [vmem:[#allocation2 + $0x8] sm:$0xff] %v1321_v60  ;;  %v1320_v15 = vadd.f32 %v2376_v28, %v1219_v44  ;;  %v1237_v51 = vadd.f32 %v1726_v5, %v1072_v48  ;;  %v1066_v16 = vadd.f32 %v1065_v1, %v867_v17  ;;  %v1735_v32 = vpop.f32.mrf.mxu1  ;;  %v915_v60 = vadd.f32 %v2327_v0, %v725_v59  ;;  %v2486_v48 = vld [vmem:[#allocation5_spill] sm:$0xff] }
 0x195   :  { %v1697_v4 = vpop.f32.mrf.mxu0  ;;  %v571_v17 = vadd.f32 %v2486_v48, %v2309_v49  ;;  %v760_v43 = vadd.f32 %v2487_v10, %v577_v40 }
 0x196   :  { %1328 = vst [vmem:[#allocation2] sm:$0xff] %v1320_v15  ;;  %v1323_v33 = vadd.f32 %v2385_v47, %v1237_v51  ;;  %v1231_v8 = vadd.f32 %v1230_v57, %v1066_v16  ;;  %v1084_v5 = vadd.f32 %v1697_v4, %v891_v52  ;;  %v1266_v23 = vpop.f32.mrf.mxu1  ;;  %v907_v57 = vadd.f32 %v2321_v31, %v718_v24  ;;  %v2488_v15 = vld [vmem:[#allocation10_spill] sm:$0xff]  ;;  %v2489_v51 = vld [vmem:[#allocation8_spill] sm:$0xff] }
 0x197   :  { %v1077_v46 = vpop.f32.mrf.mxu0  ;;  %v559_v31 = vadd.f32 %v2287_v2, %v2305_v35  ;;  %v2434_v2 = vld [vmem:[%s2469_s2 + $0x30] sm:$0xff]  ;;  %v939_v0 = vadd.f32 %v2488_v15, %v746_v39  ;;  %v753_v4 = vadd.f32 %v2491_v58, %v571_v17  ;;  %s1776_s2 = smov [#allocation2]  }
 0x198   :  { %1331 = vst [vmem:[#allocation2 + $0x18] sm:$0xff] %v1323_v33  ;;  %v1322_v25 = vadd.f32 %v2394_v53, %v1231_v8  ;;  %v1249_v41 = vadd.f32 %v1729_v22, %v1084_v5  ;;  %v1078_v42 = vadd.f32 %v1077_v46, %v883_v7  ;;  %v1738_v45 = vpop.f32.mrf.mxu1  ;;  %v2492_v8 = vld [vmem:[#allocation11_spill] sm:$0xff]  ;;  %s1358_s11 = sshll.u32 %s1776_s2, 4  ;;  %s1359_s11 = int_to_ptr.vmem [resolvable:$true] %s1358_s11 }
 0x199   :  { %v1700_v50 = vpop.f32.mrf.mxu0  ;;  %v739_v62 = vadd.f32 %v2349_v37, %v559_v31  ;;  %v2490_v37 = vld [vmem:[#allocation6_spill] sm:$0xff]  ;;  %s1752_s12 = scalar_lea.vmem %s1359_s11, 2048  ;;  %p1757_p1 = scmp.lt.s32.totalorder %s1359_s11, %s1359_s11 }
 0x19a   :  { %1330 = vst [vmem:[#allocation2 + $0x10] sm:$0xff] %v1322_v25  ;;  %v1325_v19 = vadd.f32 %v2405_v11, %v1249_v41  ;;  %v1243_v54 = vadd.f32 %v1242_v21, %v1078_v42  ;;  %v1096_v22 = vadd.f32 %v1700_v50, %v907_v57  ;;  %v1278_v26 = vpop.f32.mrf.mxu1  ;;  %v589_v16 = vadd.f32 %v2490_v37, %v2489_v51  ;;  %v2495_v25 = vld [vmem:[#allocation12_spill] sm:$0xff]  ;;  %p1753_p0 = scmp.ne.s32.totalorder %s1359_s11, %s1752_s12  ;;  %p1758_p2 = scmp.lt.s32.totalorder %s1752_s12, %s1752_s12 }
 0x19b   :  { %v1089_v30 = vpop.f32.mrf.mxu0  ;;  %v931_v5 = vadd.f32 %v2492_v8, %v739_v62  ;;  %v955_v41 = vadd.f32 %v2495_v25, %v760_v43 }
 0x19c   :  { %1333 = vst [vmem:[#allocation2 + $0x28] sm:$0xff] %v1325_v19  ;;  %v1324_v20 = vadd.f32 %v2415_v27, %v1243_v54  ;;  %v1261_v21 = vadd.f32 %v1732_v29, %v1096_v22  ;;  %v1090_v56 = vadd.f32 %v1089_v30, %v899_v36  ;;  %v774_v42 = vadd.f32 %v2356_v38, %v589_v16  ;;  %p1759_p3 = por %p1758_p2, %p1757_p1 }
 0x19d   :  { %v1703_v35 = vpop.f32.mrf.mxu0 }
 0x19e   :  { %1332 = vst [vmem:[#allocation2 + $0x20] sm:$0xff] %v1324_v20  ;;  %v1327_v3 = vadd.f32 %v2424_v61, %v1261_v21  ;;  %v1255_v44 = vadd.f32 %v1254_v63, %v1090_v56  ;;  %v1108_v29 = vadd.f32 %v1703_v35, %v923_v18  ;;  %v1741_v63 = vpop.f32.mrf.mxu1  ;;  %v2498_v35 = vld [vmem:[#allocation15_spill] sm:$0xff]  ;;  %p1760_p4 = pnand %p1759_p3, %p1753_p0 }
 0x19f   :  { %v1101_v12 = vpop.f32.mrf.mxu0 }
 0x1a0   :  { %1335 = vst [vmem:[#allocation2 + $0x38] sm:$0xff] %v1327_v3  ;;  %v1326_v1 = vadd.f32 %v2434_v2, %v1255_v44  ;;  %v1273_v52 = vadd.f32 %v1735_v32, %v1108_v29  ;;  %v1102_v24 = vadd.f32 %v1101_v12, %v915_v60  ;;  %v583_v32 = vadd.f32 %v2494_v55, %v2493_v13  ;;  %v1290_v50 = vpop.f32.mrf.mxu1 }
 0x1a1   :  { %v1706_v7 = vpop.f32.mrf.mxu0 }
 0x1a2   :  { %1334 = vst [vmem:[#allocation2 + $0x30] sm:$0xff] %v1326_v1  ;;  %v1337_v49 = vadd.f32 %v2369_v34, %v1273_v52  ;;  %v1267_v6 = vadd.f32 %v1266_v23, %v1102_v24  ;;  %v1120_v33 = vadd.f32 %v1706_v7, %v939_v0  ;;  %v2496_v34 = vld [vmem:[#allocation13_spill] sm:$0xff]  ;;  %v767_v54 = vadd.f32 %v2359_v9, %v583_v32  ;;  %v1744_v20 = vpop.f32.mrf.mxu1 }
 0x1a3   :  { %v1113_v46 = vpop.f32.mrf.mxu0  ;;  %v947_v23 = vadd.f32 %v2496_v34, %v753_v4 }
 0x1a4   :  { %1346 = vst [vmem:[#allocation2 + $0x48] sm:$0xff] %v1337_v49  ;;  %v1336_v57 = vadd.f32 %v2376_v28, %v1267_v6  ;;  %v1285_v14 = vadd.f32 %v1738_v45, %v1120_v33  ;;  %v1114_v59 = vadd.f32 %v1113_v46, %v931_v5  ;;  %v2497_v28 = vld [vmem:[#allocation14_spill] sm:$0xff]  ;;  %v963_v60 = vadd.f32 %v2498_v35, %v767_v54 }
 0x1a5   :  { %v1709_v19 = vpop.f32.mrf.mxu0  ;;  %v971_v45 = vadd.f32 %v2497_v28, %v774_v42 }
 0x1a6   :  { %1345 = vst [vmem:[#allocation2 + $0x40] sm:$0xff] %v1336_v57  ;;  %v1339_v22 = vadd.f32 %v2385_v47, %v1285_v14  ;;  %v1279_v36 = vadd.f32 %v1278_v26, %v1114_v59  ;;  %v1132_v31 = vadd.f32 %v1709_v19, %v955_v41 }
 0x1a7   :  { %v1125_v30 = vpop.f32.mrf.mxu0 }
 0x1a8   :  { %1348 = vst [vmem:[#allocation2 + $0x58] sm:$0xff] %v1339_v22  ;;  %v1338_v38 = vadd.f32 %v2394_v53, %v1279_v36  ;;  %v1297_v18 = vadd.f32 %v1741_v63, %v1132_v31  ;;  %v1126_v39 = vadd.f32 %v1125_v30, %v947_v23  ;;  %v1302_v53 = vpop.f32.mrf.mxu1 }
 0x1a9   :  { %v1712_v21 = vpop.f32.mrf.mxu0 }
 0x1aa   :  { %1347 = vst [vmem:[#allocation2 + $0x50] sm:$0xff] %v1338_v38  ;;  %v1341_v56 = vadd.f32 %v2405_v11, %v1297_v18  ;;  %v1291_v40 = vadd.f32 %v1290_v50, %v1126_v39  ;;  %v1144_v9 = vadd.f32 %v1712_v21, %v971_v45 }
 0x1ab   :  { %v1137_v47 = vpop.f32.mrf.mxu0 }
 0x1ac   :  { %1350 = vst [vmem:[#allocation2 + $0x68] sm:$0xff] %v1341_v56  ;;  %v1340_v26 = vadd.f32 %v2415_v27, %v1291_v40  ;;  %v1309_v62 = vadd.f32 %v1744_v20, %v1144_v9  ;;  %v1138_v3 = vadd.f32 %v1137_v47, %v963_v60 }
 0x1ae   :  { %1349 = vst [vmem:[#allocation2 + $0x60] sm:$0xff] %v1340_v26  ;;  %v1343_v44 = vadd.f32 %v2424_v61, %v1309_v62  ;;  %v1303_v29 = vadd.f32 %v1302_v53, %v1138_v3 }
 0x1b0   :  { %1352 = vst [vmem:[#allocation2 + $0x78] sm:$0xff] %v1343_v44  ;;  %v1342_v11 = vadd.f32 %v2434_v2, %v1303_v29 }
 0x1b2   :  { %1351 = vst [vmem:[#allocation2 + $0x70] sm:$0xff] %v1342_v11 }
 0x1b3   :  { %1763 = shalt.err (!%p1760_p4)
}
 0x1b4   :  { %s1777_s13 = smov 128   ;;  %s1778_s14 = smov 8  }
 0x1b5   :  { %1364 = dma.vmem_to_hbm [thread:$0]  %s1359_s11, 2048, %s2470_s3, [#allocation3], %s1777_s13, %s1777_s13, %s1778_s14  }
 0x1b6   :  { %1772 = dma.done.wait [#allocation3], 2048  }
 0x1b7   :  { %1773 = vsyncadd [#allocation3], 4294965248 }
 0x1b8   :  { %1368 = vsyncpa [#allocation3], 1 }

</bundles_post_ra>
